<compile_context>
chip_gen: v5e
topology: v5e:2x2
jax: 0.10.0
libtpu: 0.0.40
codegen_flags: <defaults>
</compile_context>

<pallas_src>
import jax
import jax.numpy as jnp
from jax import lax
from jax.experimental import pallas as pl
from jax.experimental.pallas import tpu as pltpu


# ---------------------------------------------------------------------------
# Pallas kernel: whole encoder + reparameterization + Gram matrix.
# ---------------------------------------------------------------------------
def vgae_kernel(adj_ref, x_ref,
                w1_ref, b1_ref,
                wcat_ref, bcat_ref,
                eps_ref,
                zzt_ref, muls_ref):
    adj = adj_ref[...]                                  # bf16 [N, N]
    x = x_ref[...]                                      # bf16 [N, F]

    # --- GCNConv1: ReLU(A_hat @ (X @ W1) + b1) -----------------------------
    xw = jnp.dot(x, w1_ref[...], preferred_element_type=jnp.float32)       # f32 [N, INTERM]
    h = jnp.dot(adj, xw.astype(jnp.bfloat16),
                preferred_element_type=jnp.float32)                        # f32 [N, INTERM]
    h = jnp.maximum(h + b1_ref[...], 0.0)
    # Dropout: nn.Dropout is identity in eval mode (deterministic forward).

    # --- GCNConv2 (mu | logsigma2 fused into one 2L-wide projection) -------
    hw = jnp.dot(h.astype(jnp.bfloat16), wcat_ref[...],
                 preferred_element_type=jnp.float32)                       # f32 [N, 2L]
    mu_ls = jnp.dot(adj, hw.astype(jnp.bfloat16),
                    preferred_element_type=jnp.float32) + bcat_ref[...]    # f32 [N, 2L]

    latent = eps_ref.shape[1]
    mus = mu_ls[:, :latent]
    ls2 = mu_ls[:, latent:]

    # --- Reparameterization (f32): Z = mu + exp(0.5 * logsigma2) * eps -----
    z = mus + jnp.exp(0.5 * ls2) * eps_ref[...]                            # f32 [N, L]

    # --- ZZt = Z @ Z^T : contract last axes directly (no explicit z.T) -----
    zb = z.astype(jnp.bfloat16)
    zzt_ref[...] = lax.dot_general(
        zb, zb, dimension_numbers=(((1,), (1,)), ((), ())),
        preferred_element_type=jnp.float32)

    # Lane-dense packed [N, 2L] output (split into mu / logsigma2 in wrapper).
    muls_ref[...] = mu_ls


# ---------------------------------------------------------------------------
# Glue: dense normalized adjacency from edge_index (plain JAX).
# ---------------------------------------------------------------------------
def normalized_adjacency(edge_index, num_nodes):
    src, dst = edge_index[0], edge_index[1]
    a = jnp.zeros((num_nodes, num_nodes), jnp.float32).at[src, dst].set(1.0)
    # Add self-loops only where absent (matches PyG gcn_norm / add_remaining_self_loops;
    # avoids a 2.0 diagonal if edge_index already contains self-loops).
    a = jnp.maximum(a, jnp.eye(num_nodes, dtype=jnp.float32))
    deg = jnp.sum(a, axis=1)
    d_inv_sqrt = jnp.where(deg > 0, 1.0 / jnp.sqrt(deg), 0.0)
    return d_inv_sqrt[:, None] * a * d_inv_sqrt[None, :]


# ---------------------------------------------------------------------------
# Wrapper around pallas_call.
# ---------------------------------------------------------------------------
def _full_spec(shape):
    return pl.BlockSpec(shape, lambda: (0,) * len(shape))


def _vmem_limit_bytes(n, f, interm, latent):
    """Derive the scoped-VMEM request from the actual resident footprint."""
    bf16, f32 = 2, 4
    two_l = 2 * latent
    in_bytes = (n * n * bf16            # adj
                + n * f * bf16          # x
                + f * interm * bf16     # W1
                + interm * f32          # b1
                + interm * two_l * bf16 # Wcat
                + two_l * f32           # bcat
                + n * latent * f32)     # eps
    out_bytes = n * n * f32 + n * two_l * f32            # ZZt, mu|ls2 slab
    live_bytes = (2 * n * interm + 2 * n * two_l + n * latent) * f32  # xw/h/hw/mu_ls/z
    # Inputs/outputs are double-buffered by the BlockSpec pipeline; add headroom.
    total = 2 * (in_bytes + out_bytes) + live_bytes + (8 << 20)
    return int(min(100 << 20, max(32 << 20, total)))


@jax.jit
def vgae_forward(adj, x, w1, b1, wmu, bmu, wvar, bvar, eps):
    n, f = x.shape
    interm = w1.shape[1]
    latent = wmu.shape[1]

    # Fuse the two second-layer projections into one 2L-wide (128-lane) matmul.
    wcat = jnp.concatenate([wmu, wvar], axis=1)
    bcat = jnp.concatenate([bmu, bvar], axis=1)

    bf = lambda v: v.astype(jnp.bfloat16)
    args = (bf(adj), bf(x),
            bf(w1), b1.astype(jnp.float32),
            bf(wcat), bcat.astype(jnp.float32),
            eps.astype(jnp.float32))

    out_shapes = (
        jax.ShapeDtypeStruct((n, n), jnp.float32),            # ZZt
        jax.ShapeDtypeStruct((n, 2 * latent), jnp.float32),   # [mu | logsigma2]
    )
    zzt, mu_ls = pl.pallas_call(
        vgae_kernel,
        grid=(),  # single program; all operands fit VMEM at these shapes
        in_specs=[_full_spec(a.shape) for a in args],
        out_specs=(_full_spec((n, n)), _full_spec((n, 2 * latent))),
        out_shape=out_shapes,
        compiler_params=pltpu.CompilerParams(
            vmem_limit_bytes=_vmem_limit_bytes(n, f, interm, latent)),
    )(*args)
    return zzt, mu_ls[:, :latent], mu_ls[:, latent:]


# ---------------------------------------------------------------------------
# Demo / self-test.
# ---------------------------------------------------------------------------
if __name__ == "__main__":
    key = jax.random.PRNGKey(0)
    N, INPUT_DIM, INTERM_DIM, LATENT_DIM = 8, 16, 32, 64

    k_x, k_w1, k_wmu, k_wvar, k_eps = jax.random.split(key, 5)

    # Node features.
    X = jax.random.normal(k_x, (N, INPUT_DIM), dtype=jnp.float32)

    # A small deterministic edge_index (2, E): ring + a few chords.
    src = jnp.array([0, 1, 2, 3, 4, 5, 6, 7, 0, 2, 4, 6], dtype=jnp.int32)
    dst = jnp.array([1, 2, 3, 4, 5, 6, 7, 0, 4, 6, 0, 2], dtype=jnp.int32)
    edge_index = jnp.stack([src, dst], axis=0)
    # Symmetrize (undirected graph, as typical for GCN).
    edge_index = jnp.concatenate(
        [edge_index, jnp.stack([dst, src], axis=0)], axis=1)

    # Deterministic parameter init (Glorot-style scaling), biases zero.
    def glorot(k, fan_in, fan_out):
        s = jnp.sqrt(6.0 / (fan_in + fan_out))
        return jax.random.uniform(k, (fan_in, fan_out), jnp.float32, -s, s)

    W1 = glorot(k_w1, INPUT_DIM, INTERM_DIM)
    b1 = jnp.zeros((1, INTERM_DIM), jnp.float32)
    Wmu = glorot(k_wmu, INTERM_DIM, LATENT_DIM)
    bmu = jnp.zeros((1, LATENT_DIM), jnp.float32)
    Wvar = glorot(k_wvar, INTERM_DIM, LATENT_DIM)
    bvar = jnp.zeros((1, LATENT_DIM), jnp.float32)

    # eps ~ Normal(0, 1), same shape as mus (reparameterization noise).
    eps = jax.random.normal(k_eps, (N, LATENT_DIM), dtype=jnp.float32)

    adj = normalized_adjacency(edge_index, N)

    ZZt, mus, logsigma2s = vgae_forward(adj, X, W1, b1, Wmu, bmu, Wvar, bvar, eps)
    jax.block_until_ready((ZZt, mus, logsigma2s))

    # --- Reference 1: mirrors the kernel's bf16-input / f32-accum matmuls. ---
    bf = lambda v: v.astype(jnp.bfloat16)
    bdot = lambda a, b: jnp.dot(bf(a), bf(b), preferred_element_type=jnp.float32)
    H_ref = jnp.maximum(bdot(adj, bdot(X, W1)) + b1, 0.0)
    Wcat_ref = jnp.concatenate([Wmu, Wvar], axis=1)
    bcat_ref = jnp.concatenate([bmu, bvar], axis=1)
    muls_ref = bdot(adj, bdot(H_ref, Wcat_ref)) + bcat_ref
    mu_ref = muls_ref[:, :LATENT_DIM]
    ls_ref = muls_ref[:, LATENT_DIM:]
    Z_ref = mu_ref + jnp.exp(0.5 * ls_ref) * eps
    ZZt_ref = jnp.dot(bf(Z_ref), bf(Z_ref).T, preferred_element_type=jnp.float32)
    assert jnp.allclose(mus, mu_ref, atol=2e-2), "mu mismatch vs bf16 reference"
    assert jnp.allclose(logsigma2s, ls_ref, atol=2e-2), "logsigma2 mismatch vs bf16 reference"
    assert jnp.allclose(ZZt, ZZt_ref, atol=5e-2, rtol=2e-2), "ZZt mismatch vs bf16 reference"

    # --- Reference 2: full-f32 semantics (generous tolerance; bf16 MXU inputs). ---
    H32 = jnp.maximum(adj @ (X @ W1) + b1, 0.0)
    mu32 = adj @ (H32 @ Wmu) + bmu
    ls32 = adj @ (H32 @ Wvar) + bvar
    Z32 = mu32 + jnp.exp(0.5 * ls32) * eps
    ZZt32 = Z32 @ Z32.T
    assert jnp.allclose(mus, mu32, atol=5e-2, rtol=5e-2), "mu mismatch vs f32 reference"
    assert jnp.allclose(logsigma2s, ls32, atol=5e-2, rtol=5e-2), "logsigma2 mismatch vs f32 reference"
    assert jnp.allclose(ZZt, ZZt32, atol=1e-1, rtol=5e-2), "ZZt mismatch vs f32 reference"

    print("KERNEL_OK")
</pallas_src>

<mosaic_0001>
module attributes {stable_mosaic.version = 11 : i64} {
  func.func @vgae_kernel(%arg0: memref<8x8xbf16, #tpu.memory_space<vmem>>, %arg1: memref<8x16xbf16, #tpu.memory_space<vmem>>, %arg2: memref<16x32xbf16, #tpu.memory_space<vmem>>, %arg3: memref<1x32xf32, #tpu.memory_space<vmem>>, %arg4: memref<32x128xbf16, #tpu.memory_space<vmem>>, %arg5: memref<1x128xf32, #tpu.memory_space<vmem>>, %arg6: memref<8x64xf32, #tpu.memory_space<vmem>>, %arg7: memref<8x8xf32, #tpu.memory_space<vmem>>, %arg8: memref<8x128xf32, #tpu.memory_space<vmem>>) attributes {dimension_semantics = [], scalar_prefetch = 0 : i64, scratch_operands = 0 : i64, tpu.core_type = #tpu.core_type<tc>} {
    %c0 = arith.constant 0 : index
    %c0_0 = arith.constant 0 : index
    %0 = vector.load %arg0[%c0, %c0_0] : memref<8x8xbf16, #tpu.memory_space<vmem>>, vector<8x8xbf16>
    %c0_1 = arith.constant 0 : index
    %c0_2 = arith.constant 0 : index
    %1 = vector.load %arg1[%c0_1, %c0_2] : memref<8x16xbf16, #tpu.memory_space<vmem>>, vector<8x16xbf16>
    %c0_3 = arith.constant 0 : index
    %c0_4 = arith.constant 0 : index
    %2 = vector.load %arg2[%c0_3, %c0_4] : memref<16x32xbf16, #tpu.memory_space<vmem>>, vector<16x32xbf16>
    %cst = arith.constant dense<0.000000e+00> : vector<8x32xf32>
    %3 = tpu.matmul %1, %2, %cst {dimension_numbers = #tpu.dot_dimension_numbers<[1], [0], [0], [1], [0, 0, 1, 1], [], []>} : vector<8x16xbf16>, vector<16x32xbf16>, vector<8x32xf32> -> vector<8x32xf32>
    %4 = arith.truncf %3 : vector<8x32xf32> to vector<8x32xbf16>
    %cst_5 = arith.constant dense<0.000000e+00> : vector<8x32xf32>
    %5 = tpu.matmul %0, %4, %cst_5 {dimension_numbers = #tpu.dot_dimension_numbers<[1], [0], [0], [1], [0, 0, 1, 1], [], []>} : vector<8x8xbf16>, vector<8x32xbf16>, vector<8x32xf32> -> vector<8x32xf32>
    %c0_6 = arith.constant 0 : index
    %c0_7 = arith.constant 0 : index
    %6 = vector.load %arg3[%c0_6, %c0_7] : memref<1x32xf32, #tpu.memory_space<vmem>>, vector<1x32xf32>
    %7 = vector.broadcast %6 : vector<1x32xf32> to vector<8x32xf32>
    %8 = arith.addf %5, %7 : vector<8x32xf32>
    %cst_8 = arith.constant 0.000000e+00 : f32
    %9 = vector.broadcast %cst_8 : f32 to vector<8x32xf32>
    %10 = arith.maximumf %8, %9 : vector<8x32xf32>
    %11 = arith.truncf %10 : vector<8x32xf32> to vector<8x32xbf16>
    %c0_9 = arith.constant 0 : index
    %c0_10 = arith.constant 0 : index
    %12 = vector.load %arg4[%c0_9, %c0_10] : memref<32x128xbf16, #tpu.memory_space<vmem>>, vector<32x128xbf16>
    %cst_11 = arith.constant dense<0.000000e+00> : vector<8x128xf32>
    %13 = tpu.matmul %11, %12, %cst_11 {dimension_numbers = #tpu.dot_dimension_numbers<[1], [0], [0], [1], [0, 0, 1, 1], [], []>} : vector<8x32xbf16>, vector<32x128xbf16>, vector<8x128xf32> -> vector<8x128xf32>
    %14 = arith.truncf %13 : vector<8x128xf32> to vector<8x128xbf16>
    %cst_12 = arith.constant dense<0.000000e+00> : vector<8x128xf32>
    %15 = tpu.matmul %0, %14, %cst_12 {dimension_numbers = #tpu.dot_dimension_numbers<[1], [0], [0], [1], [0, 0, 1, 1], [], []>} : vector<8x8xbf16>, vector<8x128xbf16>, vector<8x128xf32> -> vector<8x128xf32>
    %c0_13 = arith.constant 0 : index
    %c0_14 = arith.constant 0 : index
    %16 = vector.load %arg5[%c0_13, %c0_14] : memref<1x128xf32, #tpu.memory_space<vmem>>, vector<1x128xf32>
    %17 = vector.broadcast %16 : vector<1x128xf32> to vector<8x128xf32>
    %18 = arith.addf %15, %17 : vector<8x128xf32>
    %19 = vector.extract_strided_slice %18 {offsets = [0, 0], sizes = [8, 64], strides = [1, 1]} : vector<8x128xf32> to vector<8x64xf32>
    %20 = vector.extract_strided_slice %18 {offsets = [0, 64], sizes = [8, 64], strides = [1, 1]} : vector<8x128xf32> to vector<8x64xf32>
    %cst_15 = arith.constant 5.000000e-01 : f32
    %21 = vector.broadcast %cst_15 : f32 to vector<8x64xf32>
    %22 = arith.mulf %21, %20 : vector<8x64xf32>
    %23 = math.exp %22 : vector<8x64xf32>
    %c0_16 = arith.constant 0 : index
    %c0_17 = arith.constant 0 : index
    %24 = vector.load %arg6[%c0_16, %c0_17] : memref<8x64xf32, #tpu.memory_space<vmem>>, vector<8x64xf32>
    %25 = arith.mulf %23, %24 : vector<8x64xf32>
    %26 = arith.addf %19, %25 : vector<8x64xf32>
    %27 = arith.truncf %26 : vector<8x64xf32> to vector<8x64xbf16>
    %cst_18 = arith.constant dense<0.000000e+00> : vector<8x8xf32>
    %28 = tpu.matmul %27, %27, %cst_18 {dimension_numbers = #tpu.dot_dimension_numbers<[1], [1], [0], [0], [0, 0, 1, 0], [], []>} : vector<8x64xbf16>, vector<8x64xbf16>, vector<8x8xf32> -> vector<8x8xf32>
    %c0_19 = arith.constant 0 : index
    %c0_20 = arith.constant 0 : index
    %29 = vector.load %arg7[%c0_19, %c0_20] : memref<8x8xf32, #tpu.memory_space<vmem>>, vector<8x8xf32>
    tpu.vector_store %arg7[%c0_19, %c0_20], %28 {strides = array<i32>} : memref<8x8xf32, #tpu.memory_space<vmem>>, vector<8x8xf32>,
    %c0_21 = arith.constant 0 : index
    %c0_22 = arith.constant 0 : index
    %30 = vector.load %arg8[%c0_21, %c0_22] : memref<8x128xf32, #tpu.memory_space<vmem>>, vector<8x128xf32>
    tpu.vector_store %arg8[%c0_21, %c0_22], %18 {strides = array<i32>} : memref<8x128xf32, #tpu.memory_space<vmem>>, vector<8x128xf32>,
    return
  }
}

</mosaic_0001>

<bundles_post_ra>
// kernel: vgae_forward.1
= control target key start
LH: loop header
LB: loop body
LE: loop exit
PB: predicated region body
PF: predicated region fallthrough
CT: control target
= control target key end

     0   :  { %s327_s0 = inlined_call_operand.vmem [shape: bf16[8,8], index: 0, kind: input, shape index: {}]   ;;  %s328_s1 = inlined_call_operand.vmem [shape: bf16[8,16], index: 1, kind: input, shape index: {}]   ;;  %s329_s2 = inlined_call_operand.vmem [shape: bf16[16,32], index: 2, kind: input, shape index: {}]   ;;  %s330_s3 = inlined_call_operand.vmem [shape: f32[1,32], index: 3, kind: input, shape index: {}]   ;;  %s331_s4 = inlined_call_operand.vmem [shape: bf16[32,128], index: 4, kind: input, shape index: {}]   ;;  %s332_s5 = inlined_call_operand.vmem [shape: f32[1,128], index: 5, kind: input, shape index: {}]   ;;  %s333_s6 = inlined_call_operand.vmem [shape: f32[8,64], index: 6, kind: input, shape index: {}]   ;;  %s334_s7 = inlined_call_operand.hbm [shape: f32[8,8], index: 7, kind: output, shape index: {0}]   ;;  %s335_s8 = inlined_call_operand.vmem [shape: f32[8,128], index: 8, kind: output, shape index: {1}]  }
   0x1   :  { %v210_v0 = vld [vmem:[%s329_s2] sm:$0xff] }
   0x2   :  { %14 = vsyncpa [#allocation3], 0  ;;  %51 = vmatpush.bf16.msra.mxu0 %v210_v0  ;;  %v31_v1 = vld [vmem:[%s328_s1] sm:$0xf]  ;;  %vm40_vm0 = vcmask 130048   ;;  %vm66_vm1 = vcmask 1043456  }
   0x3   :  { %v30_v5 = vld [vmem:[%s327_s0] sm:$0xf]  ;;  %vm62_vm2 = vcmask 64512   ;;  %v212_v7 = vld [vmem:[%s331_s4 + $0x8] sm:$0xff]  ;;  %vm101_vm3 = vcmask 261120   ;;  %s245_s16 = smov 64  }
   0x4   :  { %111 = vmatpush.bf16.msra.mxu2 %v212_v7  ;;  %v211_v8 = vld [vmem:[%s331_s4] sm:$0xff]  ;;  %vm154_vm4 = vcmask 523264  }
   0x5   :  { %197 = vmatmul.msk.bf16.vlgmr.msra.gmra.mxu0 %vm40_vm0, %v31_v1  ;;  %v215_v9 = vld [vmem:[%s330_s3] ss:$0 sm:$0xff] }
   0x6   :  { %v142_v15 = vld [vmem:[%s333_s6] sm:$0xff] }
   0x7   :  { %144 = vrot.lane.b32.xlu0 %v142_v15, %s245_s16  ;;  %v216_v20 = vld [vmem:[%s332_s5] ss:$0 sm:$0xff]  ;;  %s246_s5 = smov [#allocation2]  }
   0x8   :  { %112 = vmatpush.bf16.msra.mxu2 %v211_v8  ;;  %s178_s6 = sshll.u32 %s246_s5, 4  ;;  %s179_s6 = int_to_ptr.vmem [resolvable:$true] %s178_s6 }
  0x79   :  { %v145_v26 = vpop.permute.xlu0 %144 }
  0x82   :  { %v53_v2 = vpop.f32.mrf.mxu0 }
  0x83   :  { %v57_v3 = vpack.c.bf16 %v53_v2, %v53_v2 }
  0x85   :  { %v68_v4 = vsel %vm66_vm1, %v57_v3, 0 }
  0x86   :  { %77 = vmatpush.bf16.msra.mxu1 %v68_v4 }
  0x89   :  { %198 = vmatmul.msk.bf16.vlgmr.msra.gmra.mxu1 %vm62_vm2, %v30_v5 }
  0x8a   :  { %v55_v6 = vpop.f32.mrf.mxu0 }
 0x106   :  { %v79_v10 = vpop.f32.mrf.mxu1 }
 0x107   :  { %v80_v11 = vadd.f32 %v215_v9, %v79_v10 }
 0x109   :  { %v83_v12 = vmax.f32 %v80_v11, 0.0 }
 0x10b   :  { %v84_v13 = vpack.c.bf16 %v83_v12, %v83_v12 }
 0x10d   :  { %207 = vmatmul.msk.bf16.vlgmr.msra.gmra.mxu2 %vm101_vm3, %v84_v13 }
 0x10e   :  { %v81_v14 = vpop.f32.mrf.mxu1 }
 0x190   :  { %v114_v16 = vpop.f32.mrf.mxu2 }
 0x191   :  { %v118_v17 = vpack.c.bf16 %v114_v16, %v114_v16 }
 0x193   :  { %v124_v18 = vsel %vm66_vm1, %v118_v17, 0 }
 0x194   :  { %133 = vmatpush.bf16.msra.mxu3 %v124_v18 }
 0x197   :  { %208 = vmatmul.msk.bf16.vlgmr.msra.gmra.mxu3 %vm62_vm2, %v30_v5 }
 0x198   :  { %v116_v19 = vpop.f32.mrf.mxu2 }
 0x21a   :  { %v135_v21 = vpop.f32.mrf.mxu3 }
 0x21b   :  { %v136_v22 = vadd.f32 %v216_v20, %v135_v21 }
 0x21d   :  { %v139_v23 = vmul.f32 0.5, %v136_v22  ;;  %172 = vst [vmem:[%s335_s8] sm:$0xff] %v136_v22  ;;  %s180_s8 = sshll.u32 %s334_s7, 4  ;;  %s181_s8 = int_to_ptr.hbm [resolvable:$true] %s180_s8 }
 0x21f   :  { %v140_v24 = vmul.f32 1.442695, %v139_v23 }
 0x221   :  { %217 = vpow2.f32 %v140_v24 }
 0x222   :  { %v137_v25 = vpop.f32.mrf.mxu3 }
 0x227   :  { %v218_v27 = vpop.eup %217 }
 0x228   :  { %v147_v28 = vmul.f32 %v218_v27, %v145_v26 }
 0x22a   :  { %149 = vrot.lane.b32.xlu0 %v147_v28, %s245_s16 }
 0x29c   :  { %v150_v29 = vpop.permute.xlu0 %149 }
 0x29d   :  { %v152_v30 = vadd.f32 %v150_v29, %v136_v22 }
 0x29f   :  { %v153_v31 = vpack.c.bf16 %v152_v30, %v152_v30 }
 0x2a1   :  { %v156_v32 = vsel %vm154_vm4, %v153_v31, 0 }
 0x2a2   :  { %165 = vmatpush.bf16.xpose.msrb.mxu0 %v156_v32 }
 0x2a9   :  { %209 = vmatmul.msk.bf16.vlgmr.msrb.gmra.mxu0 %vm154_vm4, %v153_v31 }
 0x326   :  { %v167_v33 = vpop.f32.mrf.mxu0 }
 0x327   :  { %171 = vst.msk [vmem:[#allocation2] sm:$0xff] %vm62_vm2, %v167_v33 }
 0x328   :  { %183 = dma.vmem_to_hbm [thread:$0]  %s179_s6, 128, %s181_s8, [#allocation3]  }
 0x32e   :  { %v169_v34 = vpop.f32.mrf.mxu0 }
 0x32f   :  { %243 = dma.done.wait [#allocation3], 128  }
 0x330   :  { %244 = vsyncadd [#allocation3], 4294967168 }
 0x331   :  { %192 = vsyncpa [#allocation3], 1 }

</bundles_post_ra>
